<compile_context>
chip_gen: v7x
topology: tpu7x:2x2x1
jax: 0.10.0
libtpu: 0.0.40
codegen_flags: <defaults>
</compile_context>

<pallas_src>
import jax
import jax.numpy as jnp
from jax.experimental import pallas as pl
from jax.experimental.pallas import tpu as pltpu

EPS = 1e-5


def _round_up(x, m):
    return (x + m - 1) // m * m


def _cdiv(a, b):
    return -(-a // b)


# ---------------------------------------------------------------------------
# Pass 1: conv-as-matmul (bf16 MXU, f32 accumulation) + per-channel partial
# sum / sum-of-squares accumulated in resident (8, C_pad) output blocks.
# Grid: (shard [parallel], m-tile [arbitrary]).
# ---------------------------------------------------------------------------
def conv_stats_kernel(p_ref, w_ref, y_ref, s1_ref, s2_ref):
    t = pl.program_id(1)

    @pl.when(t == 0)
    def _():
        s1_ref[...] = jnp.zeros_like(s1_ref)
        s2_ref[...] = jnp.zeros_like(s2_ref)

    # NOTE: conv bias intentionally omitted -- it is exactly cancelled by the
    # training-mode BatchNorm mean subtraction.
    y = jnp.dot(p_ref[...], w_ref[...], preferred_element_type=jnp.float32)
    y_ref[...] = y.astype(y_ref.dtype)

    # Sublane-parallel partial stats: (TM, C) -> (TM//8, 8, C) and reduce the
    # leading dim (pure VPU adds); sublanes are collapsed once, outside.
    tm, c = y.shape
    yr = y.reshape(tm // 8, 8, c)
    s1_ref[...] += jnp.sum(yr, axis=0)
    s2_ref[...] += jnp.sum(yr * yr, axis=0)


# ---------------------------------------------------------------------------
# Pass 2: pre-folded BN scale/shift + ReLU — pure FMA stream over M tiles.
# ---------------------------------------------------------------------------
def bn_relu_kernel(y_ref, ss_ref, o_ref):
    scale = ss_ref[0:1, :]                      # (1, C_pad)
    shift = ss_ref[1:2, :]                      # (1, C_pad)
    y = y_ref[...].astype(jnp.float32)
    o_ref[...] = jnp.maximum(y * scale + shift, 0.0).astype(o_ref.dtype)


def _choose_tiling(m, tile_m, k_pad, c_pad, vmem_budget):
    """Pick (num_shards, total_tiles, TM): padding waste < 8 rows/tile, pass-1
    per-step working set within the VMEM budget."""
    target = max(8, tile_m)
    while True:
        n_tiles = max(1, _cdiv(m, target))
        shards = 2 if n_tiles >= 2 else 1        # feeds both TCs on v7x; a harmless
        n_tiles = _round_up(n_tiles, shards)     #   serial split on 1-TC chips
        tm = _round_up(_cdiv(m, n_tiles), 8)
        est = (2 * tm * k_pad * 2                # patch tile, double-buffered, bf16
               + 2 * k_pad * c_pad * 2           # resident weights (x2 to be safe), bf16
               + 2 * tm * c_pad * 2              # y tile, double-buffered, bf16
               + 4 * 8 * c_pad * 4)              # stat partial blocks, f32
        if est <= vmem_budget or tm <= 64:
            return shards, n_tiles, tm
        target = max(8, target // 2)


def down_block_2d(x_nchw, weight, bias, gamma, beta, *, stride=2, padding=1,
                  tile_m=512, compute_dtype=jnp.bfloat16, data_format="NCHW"):
    # `bias` is kept for API parity with nn.Conv2d but unused: training-mode BN
    # mean subtraction cancels a per-channel bias exactly.  (It would have to
    # be re-added if this block were evaluated with eval-mode running stats.)
    del bias

    N, C_in, H, W = x_nchw.shape
    C_out, _, KH, KW = weight.shape
    H_out = (H + 2 * padding - KH) // stride + 1
    W_out = (W + 2 * padding - KW) // stride + 1
    M = N * H_out * W_out
    K = KH * KW * C_in

    # ---- glue: im2col patch extraction (pure indexing, done once in XLA, bf16) ----
    # TODO(synk): for large realistic shapes, move patch extraction in-kernel
    # (grid axis over the KH*KW taps fed from phase-decomposed strided views,
    # or a manual pl.ANY + make_async_copy slab pipeline) so the KH*KW-inflated
    # patch matrix never round-trips HBM.
    x = jnp.transpose(x_nchw, (0, 2, 3, 1)).astype(compute_dtype)   # NHWC, bf16
    x = jnp.pad(x, ((0, 0), (padding, padding), (padding, padding), (0, 0)))
    patches = []
    for kh in range(KH):
        for kw in range(KW):
            patches.append(
                x[:, kh:kh + stride * H_out:stride, kw:kw + stride * W_out:stride, :])
    p = jnp.stack(patches, axis=3).reshape(M, K)

    w = jnp.transpose(weight, (2, 3, 1, 0)).reshape(K, C_out).astype(compute_dtype)

    # ---- lane/sublane friendly padding + chip-aware tiling ----
    C_pad = _round_up(C_out, 128)        # lane-dense output -> no masked vst
    K_pad = _round_up(K, 128)            # clean MXU contraction dimension

    try:
        vmem_cap = pltpu.get_tpu_info().vmem_capacity_bytes
    except Exception:
        vmem_cap = 64 * 1024 * 1024      # v7x-safe fallback
    # 64 MiB headroom on 128-MiB-VMEM chips (v5e/v6e); stay at 32 MiB on v7x.
    vmem_limit = (64 * 1024 * 1024 if vmem_cap >= 128 * 1024 * 1024
                  else 32 * 1024 * 1024)

    S, n_tiles, TM = _choose_tiling(M, tile_m, K_pad, C_pad, vmem_limit // 2)
    T = n_tiles // S                     # m-tiles per shard
    M_pad = TM * n_tiles                 # < 8 padded rows per tile

    # Zero padding is numerically exact: padded rows/cols contribute nothing to
    # the matmul or the statistics (no bias in-kernel); we divide by the true M.
    p = jnp.pad(p, ((0, M_pad - M), (0, K_pad - K)))
    w = jnp.pad(w, ((0, K_pad - K), (0, C_pad - C_out)))

    # ---- pass 1: sharded, tiled bf16 matmul + per-channel partial stats ----
    y_lo, ps1, ps2 = pl.pallas_call(
        conv_stats_kernel,
        out_shape=(
            jax.ShapeDtypeStruct((M_pad, C_pad), compute_dtype),   # pre-BN activations (bf16)
            jax.ShapeDtypeStruct((S * 8, C_pad), jnp.float32),     # partial sums
            jax.ShapeDtypeStruct((S * 8, C_pad), jnp.float32),     # partial sumsq
        ),
        grid=(S, T),
        in_specs=[
            pl.BlockSpec((TM, K_pad), lambda s, t: (s * T + t, 0)),
            pl.BlockSpec((K_pad, C_pad), lambda s, t: (0, 0)),
        ],
        out_specs=(
            pl.BlockSpec((TM, C_pad), lambda s, t: (s * T + t, 0)),
            pl.BlockSpec((8, C_pad), lambda s, t: (s, 0)),
            pl.BlockSpec((8, C_pad), lambda s, t: (s, 0)),
        ),
        compiler_params=pltpu.CompilerParams(
            dimension_semantics=("parallel", "arbitrary"),
            vmem_limit_bytes=vmem_limit),
    )(p, w)

    # ---- fold BN into per-channel scale/shift once (tiny O(C) XLA op) ----
    # Stats are taken from the pre-rounding f32 matmul output (bf16 storage of
    # y introduces only a negligible stats/apply mismatch).
    inv_m = 1.0 / M
    s1 = jnp.sum(ps1, axis=0)            # collapse shards + sublanes -> (C_pad,)
    s2 = jnp.sum(ps2, axis=0)
    mean = s1 * inv_m
    # TODO(synk): for very large M switch to a shifted / pairwise-combined
    # variance to avoid E[x^2]-E[x]^2 cancellation.
    var = jnp.maximum(s2 * inv_m - mean * mean, 0.0)
    g = jnp.pad(gamma.astype(jnp.float32), (0, C_pad - C_out), constant_values=1.0)
    b = jnp.pad(beta.astype(jnp.float32), (0, C_pad - C_out))
    scale = g * jax.lax.rsqrt(var + EPS)
    shift = b - mean * scale
    ss = jnp.stack([scale, shift], axis=0)                 # (2, C_pad) f32

    # ---- pass 2: pure y*scale+shift + ReLU stream (bf16 in, f32 out) ----
    out = pl.pallas_call(
        bn_relu_kernel,
        out_shape=jax.ShapeDtypeStruct((M_pad, C_pad), jnp.float32),
        grid=(n_tiles,),
        in_specs=[
            pl.BlockSpec((TM, C_pad), lambda i: (i, 0)),
            pl.BlockSpec((2, C_pad), lambda i: (0, 0)),
        ],
        out_specs=pl.BlockSpec((TM, C_pad), lambda i: (i, 0)),
        compiler_params=pltpu.CompilerParams(
            dimension_semantics=("parallel",),
            vmem_limit_bytes=vmem_limit),
    )(y_lo, ss)

    out = out[:M, :C_out].reshape(N, H_out, W_out, C_out)
    if data_format == "NHWC":
        return out            # avoids the extra output-sized layout pass entirely
    # TODO(synk): fold this NHWC->NCHW epilogue copy into pass 2 (NCHW-blocked
    # out_spec / in-kernel pltpu.einshape) when the consumer requires NCHW.
    return jnp.transpose(out, (0, 3, 1, 2))


def reference(x, weight, bias, gamma, beta, *, stride=2, padding=1):
    y = jax.lax.conv_general_dilated(
        x, weight, window_strides=(stride, stride),
        padding=((padding, padding), (padding, padding)),
        dimension_numbers=("NCHW", "OIHW", "NCHW"),
        precision=jax.lax.Precision.HIGHEST)
    y = y + bias.reshape(1, -1, 1, 1)
    mean = jnp.mean(y, axis=(0, 2, 3), keepdims=True)
    var = jnp.mean(jnp.square(y - mean), axis=(0, 2, 3), keepdims=True)
    y = (y - mean) * jax.lax.rsqrt(var + EPS)
    y = y * gamma.reshape(1, -1, 1, 1) + beta.reshape(1, -1, 1, 1)
    return jnp.maximum(y, 0.0)


if __name__ == "__main__":
    key = jax.random.PRNGKey(0)
    k_x, k_w, k_b = jax.random.split(key, 3)

    N, C_in, H, W = 2, 4, 16, 16
    C_out, KH, KW = 8, 3, 3

    x = jax.random.normal(k_x, (N, C_in, H, W), dtype=jnp.float32)

    # deterministic parameter init (PyTorch-style uniform bounds for conv,
    # gamma=1 / beta=0 for BatchNorm2d)
    fan_in = C_in * KH * KW
    bound = 1.0 / (fan_in ** 0.5)
    weight = jax.random.uniform(k_w, (C_out, C_in, KH, KW),
                                minval=-bound, maxval=bound, dtype=jnp.float32)
    bias = jax.random.uniform(k_b, (C_out,),
                              minval=-bound, maxval=bound, dtype=jnp.float32)
    gamma = jnp.ones((C_out,), jnp.float32)
    beta = jnp.zeros((C_out,), jnp.float32)

    # tile_m=32 so the small demo exercises the 2-shard parallel axis, the
    # multi-tile stats accumulation, and the pl.when init path.
    out = down_block_2d(x, weight, bias, gamma, beta, tile_m=32)
    out = jax.block_until_ready(out)

    ref = reference(x, weight, bias, gamma, beta)
    assert out.shape == (N, C_out, H // 2, W // 2)
    err = float(jnp.max(jnp.abs(out - ref)))
    # bf16 streaming path (patch matrix / weights / pre-BN intermediate), f32
    # MXU accumulation -> tolerance sized for bf16 rounding of unit-scale data.
    assert jnp.allclose(out, ref, atol=5e-2, rtol=5e-2), err

    print("KERNEL_OK")
</pallas_src>

<mosaic_0001>
module attributes {stable_mosaic.version = 11 : i64} {
  func.func @conv_stats_kernel(%arg0: i32, %arg1: i32, %arg2: memref<32x128xbf16, #tpu.memory_space<vmem>>, %arg3: memref<128x128xbf16, #tpu.memory_space<vmem>>, %arg4: memref<32x128xbf16, #tpu.memory_space<vmem>>, %arg5: memref<8x128xf32, #tpu.memory_space<vmem>>, %arg6: memref<8x128xf32, #tpu.memory_space<vmem>>) attributes {dimension_semantics = [#tpu.dimension_semantics<parallel>, #tpu.dimension_semantics<arbitrary>], iteration_bounds = array<i64: 2, 2>, scalar_prefetch = 0 : i64, scratch_operands = 0 : i64, tpu.core_type = #tpu.core_type<tc>, window_params = [{transform_indices = @transform_0, window_bounds = array<i64: 32, 128>}, {pipeline_mode = #tpu.pipeline_mode<synchronous>, transform_indices = @transform_1, window_bounds = array<i64: 128, 128>}, {transform_indices = @transform_2, window_bounds = array<i64: 32, 128>}, {transform_indices = @transform_3, window_bounds = array<i64: 8, 128>}, {transform_indices = @transform_4, window_bounds = array<i64: 8, 128>}]} {
    %c0_i32 = arith.constant 0 : i32
    %0 = arith.cmpi eq, %arg1, %c0_i32 : i32
    %1 = arith.extui %0 : i1 to i32
    %c0_i32_0 = arith.constant 0 : i32
    %2 = arith.cmpi ne, %1, %c0_i32_0 : i32
    scf.if %2 {
      %cst_16 = arith.constant 0.000000e+00 : f32
      %18 = vector.broadcast %cst_16 : f32 to vector<8x128xf32>
      %c0_17 = arith.constant 0 : index
      %c0_18 = arith.constant 0 : index
      %19 = vector.load %arg5[%c0_17, %c0_18] : memref<8x128xf32, #tpu.memory_space<vmem>>, vector<8x128xf32>
      tpu.vector_store %arg5[%c0_17, %c0_18], %18 {strides = array<i32>} : memref<8x128xf32, #tpu.memory_space<vmem>>, vector<8x128xf32>,
      %cst_19 = arith.constant 0.000000e+00 : f32
      %20 = vector.broadcast %cst_19 : f32 to vector<8x128xf32>
      %c0_20 = arith.constant 0 : index
      %c0_21 = arith.constant 0 : index
      %21 = vector.load %arg6[%c0_20, %c0_21] : memref<8x128xf32, #tpu.memory_space<vmem>>, vector<8x128xf32>
      tpu.vector_store %arg6[%c0_20, %c0_21], %20 {strides = array<i32>} : memref<8x128xf32, #tpu.memory_space<vmem>>, vector<8x128xf32>,
    } else {
    }
    %c0 = arith.constant 0 : index
    %c0_1 = arith.constant 0 : index
    %3 = vector.load %arg2[%c0, %c0_1] : memref<32x128xbf16, #tpu.memory_space<vmem>>, vector<32x128xbf16>
    %c0_2 = arith.constant 0 : index
    %c0_3 = arith.constant 0 : index
    %4 = vector.load %arg3[%c0_2, %c0_3] : memref<128x128xbf16, #tpu.memory_space<vmem>>, vector<128x128xbf16>
    %cst = arith.constant dense<0.000000e+00> : vector<32x128xf32>
    %5 = tpu.matmul %3, %4, %cst {dimension_numbers = #tpu.dot_dimension_numbers<[1], [0], [0], [1], [0, 0, 1, 1], [], []>} : vector<32x128xbf16>, vector<128x128xbf16>, vector<32x128xf32> -> vector<32x128xf32>
    %6 = arith.truncf %5 : vector<32x128xf32> to vector<32x128xbf16>
    %c0_4 = arith.constant 0 : index
    %c0_5 = arith.constant 0 : index
    %7 = vector.load %arg4[%c0_4, %c0_5] : memref<32x128xbf16, #tpu.memory_space<vmem>>, vector<32x128xbf16>
    tpu.vector_store %arg4[%c0_4, %c0_5], %6 {strides = array<i32>} : memref<32x128xbf16, #tpu.memory_space<vmem>>, vector<32x128xbf16>,
    %8 = vector.shape_cast %5 : vector<32x128xf32> to vector<4x8x128xf32>
    %c0_6 = arith.constant 0 : index
    %c0_7 = arith.constant 0 : index
    %9 = vector.load %arg5[%c0_6, %c0_7] : memref<8x128xf32, #tpu.memory_space<vmem>>, vector<8x128xf32>
    %cst_8 = arith.constant dense<0.000000e+00> : vector<8x128xf32>
    %10 = vector.multi_reduction <add>, %8, %cst_8 [0] : vector<4x8x128xf32> to vector<8x128xf32>
    %11 = arith.addf %9, %10 : vector<8x128xf32>
    %c0_9 = arith.constant 0 : index
    %c0_10 = arith.constant 0 : index
    %12 = vector.load %arg5[%c0_9, %c0_10] : memref<8x128xf32, #tpu.memory_space<vmem>>, vector<8x128xf32>
    tpu.vector_store %arg5[%c0_9, %c0_10], %11 {strides = array<i32>} : memref<8x128xf32, #tpu.memory_space<vmem>>, vector<8x128xf32>,
    %c0_11 = arith.constant 0 : index
    %c0_12 = arith.constant 0 : index
    %13 = vector.load %arg6[%c0_11, %c0_12] : memref<8x128xf32, #tpu.memory_space<vmem>>, vector<8x128xf32>
    %14 = arith.mulf %8, %8 : vector<4x8x128xf32>
    %cst_13 = arith.constant dense<0.000000e+00> : vector<8x128xf32>
    %15 = vector.multi_reduction <add>, %14, %cst_13 [0] : vector<4x8x128xf32> to vector<8x128xf32>
    %16 = arith.addf %13, %15 : vector<8x128xf32>
    %c0_14 = arith.constant 0 : index
    %c0_15 = arith.constant 0 : index
    %17 = vector.load %arg6[%c0_14, %c0_15] : memref<8x128xf32, #tpu.memory_space<vmem>>, vector<8x128xf32>
    tpu.vector_store %arg6[%c0_14, %c0_15], %16 {strides = array<i32>} : memref<8x128xf32, #tpu.memory_space<vmem>>, vector<8x128xf32>,
    return
  }
  func.func @transform_0(%arg0: i32, %arg1: i32) -> (i32, i32) {
    %c2_i32 = arith.constant 2 : i32
    %0 = arith.muli %arg0, %c2_i32 : i32
    %1 = arith.addi %0, %arg1 : i32
    %c0_i32 = arith.constant 0 : i32
    %c0_i32_0 = arith.constant 0 : i32
    return %1, %c0_i32 : i32, i32
  }
  func.func @transform_1(%arg0: i32, %arg1: i32) -> (i32, i32) {
    %c0_i32 = arith.constant 0 : i32
    %c0_i32_0 = arith.constant 0 : i32
    %c0_i32_1 = arith.constant 0 : i32
    return %c0_i32, %c0_i32_0 : i32, i32
  }
  func.func @transform_2(%arg0: i32, %arg1: i32) -> (i32, i32) {
    %c2_i32 = arith.constant 2 : i32
    %0 = arith.muli %arg0, %c2_i32 : i32
    %1 = arith.addi %0, %arg1 : i32
    %c0_i32 = arith.constant 0 : i32
    %c0_i32_0 = arith.constant 0 : i32
    return %1, %c0_i32 : i32, i32
  }
  func.func @transform_3(%arg0: i32, %arg1: i32) -> (i32, i32) {
    %c0_i32 = arith.constant 0 : i32
    %c0_i32_0 = arith.constant 0 : i32
    return %arg0, %c0_i32 : i32, i32
  }
  func.func @transform_4(%arg0: i32, %arg1: i32) -> (i32, i32) {
    %c0_i32 = arith.constant 0 : i32
    %c0_i32_0 = arith.constant 0 : i32
    return %arg0, %c0_i32 : i32, i32
  }
}

</mosaic_0001>

<bundles_post_ra>
// kernel: tpu_custom_call.1
= control target key start
LH: loop header
LB: loop body
LE: loop exit
PB: predicated region body
PF: predicated region fallthrough
CT: control target
= control target key end

     0   :  { %s1555_s0 = inlined_call_operand.hbm [shape: bf16[128,128], index: 0, kind: input, shape index: {}]   ;;  %s1556_s1 = inlined_call_operand.hbm [shape: bf16[128,128], index: 1, kind: input, shape index: {}]   ;;  %s1557_s2 = inlined_call_operand.hbm [shape: bf16[128,128], index: 2, kind: output, shape index: {0}]   ;;  %s1558_s3 = inlined_call_operand.hbm [shape: f32[16,128], index: 3, kind: output, shape index: {1}]   ;;  %s1559_s4 = inlined_call_operand.hbm [shape: f32[16,128], index: 4, kind: output, shape index: {2}]  }
   0x1   :  { %1579 = sst [smem:[#allocation22_spill]] %s1556_s1 }
   0x2   :  { %1580 = sst [smem:[#allocation23_spill]] %s1558_s3 }
   0x3   :  { %1581 = sst [smem:[#allocation24_spill]] %s1559_s4 }
   0x4   :  { %10 = vsyncpa [#allocation3], 0 }
   0x5   :  { %12 = vsyncpa [#allocation3 + $0x1], 0 }
   0x6   :  { %13 = vsyncpa [#allocation6], 0 }
   0x7   :  { %14 = vsyncpa [#allocation4], 0 }
   0x8   :  { %16 = vsyncpa [#allocation4 + $0x1], 0 }
   0x9   :  { %17 = vsyncpa [#allocation9], 0 }
   0xa   :  { %19 = vsyncpa [#allocation9 + $0x1], 0  ;;  %s1170_s15 = smov 0   ;;  %s1172_s16 = smov 0  }
   0xb   :  { %s1174_s17 = smov 0   ;;  %s1176_s18 = smov 0  }
   0xc   :  { %s1178_s19 = smov 0   ;;  %s1180_s20 = smov 0  }
   0xd   :  { %s1182_s21 = smov 0   ;;  %s1184_s22 = smov 0  }
   0xe   :  { %s1186_s23 = smov 0   ;;  %s1188_s24 = smov 0  }
   0xf   :  { %s1190_s25 = smov 0  }
  0x10 LB: > { %1582 = sst [smem:[#allocation15_spill]] %s1105_s18  ;;  %s1224_s26 = sadd.s32 4294967295, %s1133_s25   ;;  %s1133_s25 = sphi %s1190_s25, %s25_s25   ;;  %s1129_s24 = sphi %s1188_s24, %s1628_s24   ;;  %s1125_s23 = sphi %s1186_s23, %s1627_s23   ;;  %s1121_s22 = sphi %s1184_s22, %s1626_s22   ;;  %s1117_s21 = sphi %s1182_s21, %s1618_s21   ;;  %s1113_s20 = sphi %s1180_s20, %s1625_s20   ;;  %s1109_s19 = sphi %s1178_s19, %s1624_s19   ;;  %s1105_s18 = sphi %s1176_s18, %s1623_s18   ;;  %s1101_s17 = sphi %s1174_s17, %s1622_s17   ;;  %s1097_s16 = sphi %s1172_s16, %s1621_s16   ;;  %s1093_s15 = sphi %s1170_s15, %s1620_s15  }
  0x11   : > { %1583 = sst [smem:[#allocation16_spill]] %s1125_s23  ;;  %s1560_s27 = sadd.s32 4294967294, %s1133_s25  }
  0x12   : > { %p61_p0 = scmp.ne.s32.totalorder %s1109_s19, %s1105_s18  ;;  %p1561_p1 = scmp.eq.s32.totalorder %s1224_s26, 0 }
  0x13   : > { %p1562_p2 = scmp.eq.s32.totalorder %s1224_s26, 3  ;;  %p116_p3 = scmp.eq.s32.totalorder %s1560_s27, 3 }
  0x14   : > { %p1235_p4 = por %p1561_p1, %p61_p0  ;;  %p135_p6 = scmp.ne.s32.totalorder %s1101_s17, %s1097_s16 }
  0x15   : > { %p1240_p5 = por %p116_p3, %p61_p0  ;;  %p141_p7 = scmp.ne.s32.totalorder %s1097_s16, %s1093_s15 }
  0x16   : > { %s1584_s28 = scalar_select %p1235_p4, 1, 0 }
  0x17   : > { %s1585_s30 = scalar_select %p1240_p5, 1, 0 }
  0x18   : > { %p666_p8 = scmp.ge.s32.totalorder %s1133_s25, 1  ;;  %p1250_p9 = por %p135_p6, %p1562_p2 }
  0x19   : > { %1586 = sst [smem:[#allocation17_spill]] %s1585_s30  ;;  %p175_p10 = scmp.lt.s32.totalorder %s1133_s25, 5 }
  0x1a   : > { %s1587_s5 = scalar_select %p1250_p9, 1, 0 }
  0x1b   : > { %p1255_p11 = por %p141_p7, %p116_p3  ;;  %p1259_p12 = pnand %p666_p8, %p175_p10 }
  0x1c   : > { %1588 = sst [smem:[#allocation18_spill]] %s1587_s5  ;;  %s1135_s8 = smov [#allocation5]  }
  0x1d   : > { %s1589_s6 = scalar_select %p1255_p11, 1, 0 }
  0x1e   : > { %s1591_s7 = scalar_select %p1259_p12, 1, 0 }
  0x1f   : > { %1590 = sst [smem:[#allocation19_spill]] %s1589_s6  ;;  %s187_s9 = sshll.u32 %s1135_s8, 4  ;;  %s188_s9 = int_to_ptr.vmem [resolvable:$true] %s187_s9 }
  0x20   : > { %p763_p13 = pneg %p1259_p12  ;;  %s1593_s1 = sld [smem:[#allocation22_spill]] }
  0x22   : > { %p1267_p0 = pnand %p763_p13, %p1561_p1 }
  0x24   : > { %p891_p6 = pneg %p1267_p0 }
  0x26   : > { %s889_s13 = scalar_lea.hbm %s1593_s1, 1024 }
  0x27   : > { %p890_p3 = scmp.ne.s32.totalorder %s1593_s1, %s889_s13  ;;  %p896_p10 = scmp.lt.u32.totalorder %s889_s13, %s1593_s1 }
  0x29   : > { %p892_p7 = pnand %p891_p6, %p890_p3 }
  0x2b   : > { %p893_p8 = pneg %p892_p7 }
  0x2d   : > { %p898_p13 = pnand %p896_p10, %p893_p8 }
  0x2f   : > { %901 = shalt.err (!%p898_p13)
}
  0x30   : > { %s902_s29 = scalar_lea.vmem %s188_s9, 1024  ;;  %p910_p5 = scmp.lt.s32.totalorder %s188_s9, %s188_s9 }
  0x31   : > { %p903_p1 = scmp.ne.s32.totalorder %s188_s9, %s902_s29  ;;  %p911_p9 = scmp.lt.s32.totalorder %s902_s29, %s902_s29 }
  0x33   : > { %p905_p2 = pnand %p903_p1, %p891_p6  ;;  %p912_p4 = por %p911_p9, %p910_p5 }
  0x35   : > { %p906_p11 = pneg %p905_p2 }
  0x37   : > { %p913_p12 = pnand %p912_p4, %p906_p11 }
  0x39   : > { %916 = shalt.err (!%p913_p12)
}
  0x3a   : > { %s1567_s11 = smov 64   ;;  %s1568_s27 = smov 4  }
  0x3b   : > { %766 = dma.hbm_to_vmem [thread:$0]  (!%p1267_p0), %s1593_s1, 1024, %s188_s9, [#allocation6], %s1567_s11, %s1567_s11, %s1568_s27  }
  0x3c   : > { %s34_s13 = sadd.s32 1, %s1125_s23  ;;  %s37_s14 = sadd.s32 1, %s1129_s24 }
  0x3d   : > { %p35_p1 = scmp.ge.s32.totalorder %s34_s13, 2  ;;  %s662_s15 = sshll.u32 %s1129_s24, 1 }
  0x3e   : > { %s42_s8 = sadd.s32 %s1125_s23, %s662_s15  ;;  %s48_s6 = sadd.s32 1, %s1113_s20 }
  0x3f   : > { %s1630_s13 = smov (%p35_p1, %s34_s13), 0  ;;  %s1632_s14 = smov (!%p35_p1, %s37_s14), %s1129_s24 }
  0x40   : > { %p55_p2 = scmp.ne.s32.totalorder %s1113_s20, %s1109_s19  ;;  %p56_p4 = scmp.eq.s32.totalorder %s1133_s25, 0 }
  0x41   : > { %p39_p5 = scmp.ge.s32.totalorder %s1632_s14, 2  ;;  %p782_p9 = scmp.lt.s32.totalorder %s1133_s25, 4 }
  0x42   : > { %p1302_p11 = por %p56_p4, %p55_p2  ;;  %p1595_p12 = scmp.eq.s32.totalorder %s1224_s26, 3 }
  0x43   : > { %s1634_s14 = smov (%p39_p5, %s1632_s14), 0  ;;  %s201_s29 = sand.u32 1, %s1113_s20  }
  0x44   : > { %p1308_p0 = por %p1595_p12, %p55_p2  ;;  %1598 = sst [smem:[#allocation21_spill]] %s1634_s14 }
  0x45   : > { %s704_s12 = sshll.u32 %s42_s8, 8  ;;  %s663_s15 = sshll.u32 %s1634_s14, 1 }
  0x46   : > { %s1596_s10 = scalar_select %p1308_p0, 1, 0 }
  0x47   : > { %s122_s11 = ssub.s32 %s1129_s24, %s1634_s14  ;;  %s44_s27 = sadd.s32 %s663_s15, %s1630_s13 }
  0x48   : > { %1597 = sst [smem:[#allocation20_spill]] %s1596_s10  ;;  %p123_p3 = scmp.eq.s32.totalorder %s122_s11, 0 }
  0x49   : > { %s45_s1 = ssub.s32 %s42_s8, %s44_s27  ;;  %s669_s23 = sshll.u32 %s201_s29, 4 }
  0x4a   : > { %p46_p6 = scmp.eq.s32.totalorder %s45_s1, 0  ;;  %s1599_s30 = sadd.s32 1, %s1101_s17 }
  0x4b   : > { %s1322_s18 = scalar_select %p123_p3, %s1101_s17, %s1599_s30  }
  0x4c   : > { %s1325_s4 = scalar_select %p46_p6, %s1113_s20, %s48_s6  }
  0x4d   : > { %s1330_s10 = scalar_lea.hbm %s1555_s0, %s704_s12  ;;  %s205_s14 = scalar_lea.vmem [#allocation2], %s669_s23 }
  0x4e   : > { %s214_s15 = sshll.u32 %s205_s14, 4  ;;  %p1336_p7 = pnand %p782_p9, %p1302_p11  ;;  %s1340_s15 = int_to_ptr.vmem [resolvable:$true] %s214_s15 }
  0x4f   : > { %s1342_s30 = scalar_lea.sflag [#allocation3], %s201_s29  ;;  %s917_s3 = scalar_lea.hbm %s1330_s10, 256 }
  0x50   : > { %p918_p8 = scmp.ne.s32.totalorder %s1330_s10, %s917_s3  ;;  %p919_p10 = pneg %p1336_p7 }
  0x51   : > { %s922_s6 = scalar_lea.hbm %s1555_s0, 1024  ;;  %p923_p2 = scmp.lt.u32.totalorder %s1330_s10, %s1555_s0 }
  0x52   : > { %p920_p13 = pnand %p919_p10, %p918_p8  ;;  %p924_p4 = scmp.lt.u32.totalorder %s922_s6, %s917_s3 }
  0x53   : > { %p926_p9 = scmp.lt.u32.totalorder %s917_s3, %s1330_s10 }
  0x54   : > { %p921_p1 = pneg %p920_p13  ;;  %p925_p5 = por %p924_p4, %p923_p2 }
  0x56   : > { %p927_p11 = por %p926_p9, %p925_p5 }
  0x58   : > { %p928_p12 = pnand %p927_p11, %p921_p1 }
  0x5a   : > { %931 = shalt.err (!%p928_p12)
}
  0x5b   : > { %s932_s14 = scalar_lea.vmem %s1340_s15, 256  ;;  %s1138_s8 = smov [#allocation2]  }
  0x5c   : > { %p933_p3 = scmp.ne.s32.totalorder %s1340_s15, %s932_s14  ;;  %s937_s9 = sshll.u32 %s1138_s8, 4  ;;  %s938_s9 = int_to_ptr.vmem [resolvable:$false] %s937_s9 }
  0x5d   : > { %s939_s29 = scalar_lea.vmem %s938_s9, 512  ;;  %p940_p13 = scmp.lt.s32.totalorder %s1340_s15, %s938_s9 }
  0x5e   : > { %p935_p6 = pnand %p933_p3, %p919_p10  ;;  %p941_p2 = scmp.lt.s32.totalorder %s939_s29, %s932_s14 }
  0x60   : > { %p936_p8 = pneg %p935_p6  ;;  %p942_p4 = por %p941_p2, %p940_p13 }
  0x62   : > { %p943_p5 = pnand %p942_p4, %p936_p8 }
  0x64   : > { %946 = shalt.err (!%p943_p5)
}
  0x65   : > { %s1601_s12 = smov 4   ;;  %s1602_s3 = smov 64  }
  0x66   : > { %770 = dma.hbm_to_vmem [thread:$0]  (!%p1336_p7), %s1330_s10, 256, %s1340_s15, %s1342_s30, %s1602_s3, %s1602_s3, %s1601_s12  }
  0x67   : > { %p1603_p10 = scmp.ne.s32.totalorder %s1591_s7, 0 }
  0x68   : > { %s1376_s23 = sand.u32 (!%p1603_p10), 1, %s1109_s19   ;;  %p1604_p1 = scmp.ne.s32.totalorder (!%p1603_p10), %s1584_s28, 0 }
  0x69   : > { %226 = sbr.rel (%p1603_p10) target bundleno = 440 (0x1b8), region = 28  ;;  %s674_s5 = sshll.u32 (!%p1603_p10), %s1376_s23, 4 }
  0x6a   : > { %s229_s6 = scalar_lea.sflag (!%p1603_p10), [#allocation3], %s1376_s23  ;;  %s1380_s11 = scalar_lea.vmem (!%p1603_p10), [#allocation2], %s674_s5 }
  0x70   : > { %1076 = dma.done.wait (%p1604_p1), %s229_s6, 256  }
  0x71   : > { %1078 = vsyncadd (%p1604_p1), %s229_s6, 4294967040  ;;  %p1605_p7 = scmp.eq.s32.totalorder %s1224_s26, 0 }
  0x73   : > { %1080 = dma.done.wait (%p1605_p7), [#allocation6], 1024   ;;  %p1606_p9 = pmov %p1605_p7 }
  0x74   : > { %s261_s7 = sand.u32 1, %s1097_s16   ;;  %s1391_s15 = scalar_lea.vmem [#allocation7], %s674_s5 }
  0x75   : > { %1082 = vsyncadd (%p1606_p9), [#allocation6], 4294966272  ;;  %s677_s10 = sshll.u32 %s261_s7, 3  ;;  %p679_p11 = scmp.ne.s32.totalorder %s1117_s21, 0 }
  0x76   : > { %s1393_s1 = scalar_lea.vmem [#allocation8], %s677_s10  ;;  %s1395_s30 = scalar_lea.vmem [#allocation10], %s677_s10  ;;  %v1139_v0 = vmov (!%p679_p11), 0.0  }
  0x77   : > { %281 = sbr.rel (%p679_p11) target bundleno = 126 (0x7e), region = 40  ;;  %282 = vst [vmem:[%s1393_s1] sm:$0xff] (!%p679_p11), %v1139_v0  ;;  %283 = vst [vmem:[%s1395_s30] sm:$0xff] (!%p679_p11), %v1139_v0 }
  0x7e PF: > { %v879_v1 = vld [vmem:[#allocation5] sm:$0xff]   ;;  %v880_v2 = vld [vmem:[#allocation5 + $0x8] sm:$0xff]   ;;  %v881_v3 = vld [vmem:[#allocation5 + $0x10] sm:$0xff]   ;;  %s697_s28 = sshll.u32 %s1121_s22, 1  ;;  %s475_s8 = sshll.u32 %s1391_s15, 4  ;;  %s1410_s8 = int_to_ptr.vmem [resolvable:$true] %s475_s8 }
  0x7f   : > { %731 = vmatprep.subr.bf16.mxu0 %v879_v1  ;;  %v882_v4 = vld [vmem:[#allocation5 + $0x18] sm:$0xff]   ;;  %v887_v5 = vld [vmem:[%s1380_s11] sm:$0xff]   ;;  %v884_v7 = vld [vmem:[#allocation5 + $0x28] sm:$0xff]   ;;  %s468_s27 = sadd.s32 %s1117_s21, %s697_s28  ;;  %s454_s3 = sand.u32 1, %s1224_s26  }
  0x80   : > { %732 = vmatpush3.bf16.msra.mxu0 %v879_v1  ;;  %747 = vmatprep.mubr.bf16.mxu0 %v887_v5  ;;  %v883_v6 = vld [vmem:[#allocation5 + $0x20] sm:$0xff]   ;;  %v885_v8 = vld [vmem:[#allocation5 + $0x30] sm:$0xff]   ;;  %v886_v9 = vld [vmem:[#allocation5 + $0x38] sm:$0xff]   ;;  %s709_s14 = sshll.u32 %s468_s27, 8  ;;  %s700_s5 = sshll.u32 %s1121_s22, 7 }
  0x81   : > { %733 = vmatprep.subr.bf16.mxu0 %v880_v2  ;;  %v888_v10 = vld [vmem:[%s1380_s11 + $0x8] sm:$0xff]   ;;  %s1408_s12 = scalar_lea.hbm %s1557_s2, %s709_s14  ;;  %v433_v23 = vld [vmem:[%s1393_s1] sm:$0xff]  ;;  %s491_s6 = sshll.u32 %s1393_s1, 4  ;;  %s1453_s6 = int_to_ptr.vmem [resolvable:$true] %s491_s6 }
  0x82   : > { %s450_s11 = scalar_lea.sflag [#allocation4], %s1376_s23  ;;  %s947_s7 = scalar_lea.vmem %s1410_s8, 256 }
  0x83   : > { %p948_p12 = scmp.ne.s32.totalorder %s1410_s8, %s947_s7  ;;  %s1140_s10 = smov [#allocation7]  }
  0x84   : > { %734 = vmatpush3.bf16.msra.mxu0 %v880_v2  ;;  %s951_s28 = sshll.u32 %s1140_s10, 4  ;;  %s952_s28 = int_to_ptr.vmem [resolvable:$false] %s951_s28 }
  0x85   : > { %735 = vmatprep.subr.bf16.mxu0 %v881_v3  ;;  %p949_p3 = pnand %p948_p12, %p1308_p0  ;;  %s953_s27 = scalar_lea.vmem %s952_s28, 512 }
  0x86   : > { %p954_p8 = scmp.lt.s32.totalorder %s1410_s8, %s952_s28  ;;  %p955_p13 = scmp.lt.s32.totalorder %s953_s27, %s947_s7 }
  0x87   : > { %p950_p6 = pneg %p949_p3 }
  0x88   : > { %736 = vmatpush3.bf16.msra.mxu0 %v881_v3  ;;  %p956_p2 = por %p955_p13, %p954_p8 }
  0x89   : > { %737 = vmatprep.subr.bf16.mxu0 %v882_v4 }
  0x8a   : > { %p957_p4 = pnand %p956_p2, %p950_p6 }
  0x8c   : > { %738 = vmatpush3.bf16.msra.mxu0 %v882_v4 }
  0x8d   : > { %739 = vmatprep.subr.bf16.mxu0 %v883_v6 }
  0x90   : > { %740 = vmatpush3.bf16.msra.mxu0 %v883_v6 }
  0x91   : > { %741 = vmatprep.subr.bf16.mxu0 %v884_v7 }
  0x94   : > { %742 = vmatpush3.bf16.msra.mxu0 %v884_v7 }
  0x95   : > { %743 = vmatprep.subr.bf16.mxu0 %v885_v8 }
  0x98   : > { %744 = vmatpush3.bf16.msra.mxu0 %v885_v8 }
  0x99   : > { %745 = vmatprep.subr.bf16.mxu0 %v886_v9 }
  0x9c   : > { %746 = vmatpush3.bf16.msra.mxu0 %v886_v9 }
  0x9f   : > { %748 = vmatmul.mubr.bf16.vlgmr.msra.gmra.mrb[0].mxu0 %v888_v10 }
 0x172   : > { %v749_v11 = vpop.f32.mrb[0].mxu0 }
 0x173   : > { %v398_v12 = vpop.f32.mrb[1].mxu0  ;;  %v442_v20 = vmul.f32 %v749_v11, %v749_v11 }
 0x174   : > { %v750_v13 = vpop.f32.mrb[2].mxu0  ;;  %v440_v16 = vmul.f32 %v398_v12, %v398_v12 }
 0x175   : > { %v718_v14 = vpack.c.bf16 %v750_v13, %v749_v11  ;;  %v401_v15 = vpop.f32.mrb[3].mxu0 }
 0x176   : > { %v713_v17 = vpack.c.bf16 %v401_v15, %v398_v12  ;;  %v434_v18 = vadd.f32 %v401_v15, %v398_v12  ;;  %v441_v19 = vmul.f32 %v401_v15, %v401_v15 }
 0x177   : > { %720 = vst [vmem:[%s1391_s15 + $0x8] sm:$0xff] %v718_v14  }
 0x178   : > { %714 = vst [vmem:[%s1391_s15] sm:$0xff] %v713_v17   ;;  %v435_v21 = vadd.f32 %v749_v11, %v434_v18  ;;  %v444_v22 = vadd.f32 %v441_v19, %v440_v16 }
 0x179   : > { %960 = shalt.err (!%p957_p4)
}
 0x17a   : > { %s961_s15 = scalar_lea.hbm %s1408_s12, 256  ;;  %s965_s29 = scalar_lea.hbm %s1557_s2, 1024 }
 0x17b   : > { %p962_p5 = scmp.ne.s32.totalorder %s1408_s12, %s961_s15  ;;  %p966_p7 = scmp.lt.u32.totalorder %s1408_s12, %s1557_s2 }
 0x17c   : > { %p967_p9 = scmp.lt.u32.totalorder %s965_s29, %s961_s15  ;;  %p969_p12 = scmp.lt.u32.totalorder %s961_s15, %s1408_s12 }
 0x17d   : > { %p963_p10 = pnand %p962_p5, %p1308_p0 }
 0x17e   : > { %p968_p11 = por %p967_p9, %p966_p7 }
 0x17f   : > { %p964_p1 = pneg %p963_p10 }
 0x180   : > { %p970_p3 = por %p969_p12, %p968_p11 }
 0x182   : > { %p971_p6 = pnand %p970_p3, %p964_p1 }
 0x184   : > { %974 = shalt.err (!%p971_p6)
}
 0x185   : > { %s1141_s7 = smov 64   ;;  %s1142_s27 = smov 4   ;;  %v443_v24 = vmul.f32 %v750_v13, %v750_v13  ;;  %v436_v25 = vadd.f32 %v750_v13, %v435_v21  ;;  %v445_v26 = vadd.f32 %v444_v22, %v442_v20  ;;  %v439_v27 = vld [vmem:[%s1395_s30] sm:$0xff] }
 0x186   : > { %757 = dma.vmem_to_hbm [thread:$0]  (%p1308_p0), %s1410_s8, 256, %s1408_s12, %s450_s11, %s1141_s7, %s1141_s7, %s1142_s27  }
 0x187   : > { %s1608_s15 = sld [smem:[#allocation18_spill]]  ;;  %s504_s14 = sshll.u32 %s1395_s30, 4  ;;  %v446_v28 = vadd.f32 %v445_v26, %v443_v24  ;;  %v437_v29 = vadd.f32 %v436_v25, %v433_v23  ;;  %s1463_s14 = int_to_ptr.vmem [resolvable:$true] %s504_s14 }
 0x188   : > { %s1609_s10 = sld [smem:[#allocation23_spill]]  ;;  %s1610_s12 = sld [smem:[#allocation24_spill]] }
 0x189   : > { %438 = vst [vmem:[%s1393_s1] sm:$0xff] %v437_v29  ;;  %v447_v30 = vadd.f32 %v446_v28, %v439_v27  ;;  %s1467_s11 = scalar_lea.sflag [#allocation9], %s454_s3  ;;  %s975_s7 = scalar_lea.vmem %s1453_s6, 128 }
 0x18a   : > { %p976_p0 = scmp.ne.s32.totalorder %s1453_s6, %s975_s7  ;;  %s1143_s27 = smov [#allocation8]  }
 0x18b   : > { %s979_s9 = sshll.u32 %s1143_s27, 4  ;;  %s980_s9 = int_to_ptr.vmem [resolvable:$false] %s979_s9 }
 0x18c   : > { %s981_s22 = scalar_lea.vmem %s980_s9, 256  ;;  %p982_p4 = scmp.lt.s32.totalorder %s1453_s6, %s980_s9 }
 0x18d   : > { %p1611_p8 = scmp.ne.s32.totalorder %s1608_s15, 0  ;;  %p983_p5 = scmp.lt.s32.totalorder %s981_s22, %s975_s7 }
 0x18e   : > { %s1449_s28 = scalar_lea.hbm %s1609_s10, %s700_s5  ;;  %s1461_s21 = scalar_lea.hbm %s1610_s12, %s700_s5 }
 0x18f   : > { %p977_p13 = pnand %p976_p0, %p1611_p8  ;;  %p984_p10 = por %p983_p5, %p982_p4 }
 0x191   : > { %p978_p2 = pneg %p977_p13 }
 0x193   : > { %p985_p1 = pnand %p984_p10, %p978_p2 }
 0x195   : > { %988 = shalt.err (!%p985_p1)
}
 0x196   : > { %s989_s26 = scalar_lea.hbm %s1449_s28, 128  ;;  %s993_s5 = scalar_lea.hbm %s1609_s10, 256 }
 0x197   : > { %p990_p7 = scmp.ne.s32.totalorder %s1449_s28, %s989_s26  ;;  %p994_p12 = scmp.lt.u32.totalorder %s1449_s28, %s1609_s10 }
 0x198   : > { %p995_p3 = scmp.lt.u32.totalorder %s993_s5, %s989_s26  ;;  %p997_p0 = scmp.lt.u32.totalorder %s989_s26, %s1449_s28 }
 0x199   : > { %p991_p9 = pnand %p990_p7, %p1611_p8 }
 0x19a   : > { %p996_p6 = por %p995_p3, %p994_p12 }
 0x19b   : > { %p992_p11 = pneg %p991_p9 }
 0x19c   : > { %p998_p13 = por %p997_p0, %p996_p6 }
 0x19e   : > { %p999_p2 = pnand %p998_p13, %p992_p11 }
 0x1a0   : > { %1002 = shalt.err (!%p999_p2)
}
 0x1a1   : > { %758 = dma.vmem_to_hbm [thread:$0]  (%p1611_p8), %s1453_s6, 128, %s1449_s28, %s1467_s11   ;;  %448 = vst [vmem:[%s1395_s30] sm:$0xff] %v447_v30 }
 0x1a2   : > { %s1003_s8 = scalar_lea.vmem %s1463_s14, 128  ;;  %s1144_s7 = smov [#allocation10]  }
 0x1a3   : > { %p1004_p4 = scmp.ne.s32.totalorder %s1463_s14, %s1003_s8  ;;  %s1007_s27 = sshll.u32 %s1144_s7, 4  ;;  %s1008_s27 = int_to_ptr.vmem [resolvable:$false] %s1007_s27 }
 0x1a4   : > { %s1009_s9 = scalar_lea.vmem %s1008_s27, 256  ;;  %p1010_p1 = scmp.lt.s32.totalorder %s1463_s14, %s1008_s27 }
 0x1a5   : > { %p1005_p5 = pnand %p1004_p4, %p1611_p8  ;;  %p1011_p7 = scmp.lt.s32.totalorder %s1009_s9, %s1003_s8 }
 0x1a7   : > { %p1006_p10 = pneg %p1005_p5  ;;  %p1012_p9 = por %p1011_p7, %p1010_p1 }
 0x1a9   : > { %p1013_p11 = pnand %p1012_p9, %p1006_p10 }
 0x1ab   : > { %1016 = shalt.err (!%p1013_p11)
}
 0x1ac   : > { %s1017_s30 = scalar_lea.hbm %s1461_s21, 128  ;;  %s1021_s22 = scalar_lea.hbm %s1610_s12, 256 }
 0x1ad   : > { %p1018_p12 = scmp.ne.s32.totalorder %s1461_s21, %s1017_s30  ;;  %p1022_p0 = scmp.lt.u32.totalorder %s1461_s21, %s1610_s12 }
 0x1ae   : > { %p1023_p13 = scmp.lt.u32.totalorder %s1021_s22, %s1017_s30  ;;  %p1025_p4 = scmp.lt.u32.totalorder %s1017_s30, %s1461_s21 }
 0x1af   : > { %p1019_p3 = pnand %p1018_p12, %p1611_p8 }
 0x1b0   : > { %p1024_p2 = por %p1023_p13, %p1022_p0 }
 0x1b1   : > { %p1020_p6 = pneg %p1019_p3 }
 0x1b2   : > { %p1026_p5 = por %p1025_p4, %p1024_p2 }
 0x1b4   : > { %p1027_p10 = pnand %p1026_p5, %p1020_p6 }
 0x1b6   : > { %1030 = shalt.err (!%p1027_p10)
}
 0x1b7   : > { %759 = dma.vmem_to_hbm [thread:$0]  (%p1611_p8), %s1463_s14, 128, %s1461_s21, %s1467_s11  }
 0x1b8 PF: > { %s1612_s3 = sld [smem:[#allocation15_spill]]  ;;  %s1613_s5 = sld [smem:[#allocation17_spill]] }
 0x1b9   : > { %p784_p1 = scmp.ge.s32.totalorder %s1133_s25, 2 }
 0x1be   : > { %s516_s29 = sand.u32 1, %s1612_s3   ;;  %p1614_p7 = scmp.ne.s32.totalorder %s1613_s5, 0 }
 0x1bf   : > { %s517_s23 = scalar_lea.sflag [#allocation4], %s516_s29 }
 0x1c0   : > { %p772_p9 = pnand %p784_p1, %p1614_p7 }
 0x1c2   : > { %1084 = dma.done.wait (!%p772_p9), %s517_s23, 256  }
 0x1c3   : > { %1086 = vsyncadd (!%p772_p9), %s517_s23, 4294967040  ;;  %s1615_s8 = sadd.s32 4294967294, %s1133_s25   ;;  %s1616_s7 = sld [smem:[#allocation19_spill]] }
 0x1c4   : > { %s525_s27 = sand.u32 1, %s1615_s8  }
 0x1c5   : > { %s526_s15 = scalar_lea.sflag [#allocation9], %s525_s27 }
 0x1c9   : > { %p1617_p11 = scmp.ne.s32.totalorder %s1616_s7, 0 }
 0x1cb   : > { %p775_p12 = pnand %p784_p1, %p1617_p11 }
 0x1cd   : > { %1088 = dma.done.wait (!%p775_p12), %s526_s15, 256  }
 0x1ce   : > { %1090 = vsyncadd (!%p775_p12), %s526_s15, 4294967040  ;;  %s25_s25 = sadd.s32 1, %s1133_s25   ;;  %s1618_s21 = sld [smem:[#allocation16_spill]] }
 0x1cf   : > { %p22_p8 = scmp.ge.s32.totalorder %s25_s25, 6   ;;  %s1619_s14 = sld [smem:[#allocation21_spill]] }
 0x1d0   : > { %s1620_s15 = smov %s1097_s16  ;;  %s1621_s16 = smov %s1101_s17 }
 0x1d1   : > { %s1622_s17 = smov %s1322_s18  ;;  %s1623_s18 = smov %s1109_s19 }
 0x1d2   : > { %s1624_s19 = smov %s1113_s20  ;;  %s1625_s20 = smov %s1325_s4 }
 0x1d3   : > { %s1626_s22 = smov %s1129_s24  ;;  %s1627_s23 = smov %s1630_s13 }
 0x1d4   :  { %24 = sbr.rel (!%p22_p8) target bundleno = 16 (0x10), region = 113 }
 0x1d5   : > { %s1628_s24 = smov %s1619_s14 }
 0x1db   :  { %540 = vsyncpa [#allocation3], 1 }
 0x1dc   :  { %542 = vsyncpa [#allocation3 + $0x1], 1 }
 0x1dd   :  { %543 = vsyncpa [#allocation6], 1 }
 0x1de   :  { %544 = vsyncpa [#allocation4], 1 }
 0x1df   :  { %546 = vsyncpa [#allocation4 + $0x1], 1 }
 0x1e0   :  { %547 = vsyncpa [#allocation9], 1 }
 0x1e1   :  { %549 = vsyncpa [#allocation9 + $0x1], 1 }

</bundles_post_ra>
